<compile_context>
chip_gen: v7x
topology: tpu7x:2x2x1
jax: 0.10.0
libtpu: 0.0.40
codegen_flags: <defaults>
</compile_context>

<pallas_src>
import jax
import jax.numpy as jnp
from jax import lax
from jax.experimental import pallas as pl
from jax.experimental.pallas import tpu as pltpu


def _round_up(a, b):
    return ((a + b - 1) // b) * b


# ---------------------------------------------------------------------------
# p-only collapse:  MAA(p, x) == alpha @ x
# ---------------------------------------------------------------------------
def _maa_alpha(ps):
    """Exact per-frame weights alpha (T,) such that MAA(p, x) = alpha @ x.

    The m-recursion is linear in x, so out = sum_t alpha_t x_t with alpha a
    function of p only:
      forward :  q[t+1, c] = p_t q[t, c-1] + (1-p_t) q[t, c],   q[0, 0] = 1
      adjoint :  bar[T, c] = 1 (c >= 1)
                 bar[t, c] = p_t * c/(c+1) * bar[t+1, c+1] + (1-p_t) * bar[t+1, c]
      weight  :  alpha_t   = p_t * sum_{c>=1} bar[t+1, c] * q[t, c-1] / c
    Both passes are O(T*C) scalar work (C = T+2) off the data path.
    """
    T = ps.shape[0]
    C = T + 2
    cnt = jnp.arange(C, dtype=jnp.float32)
    inv_c = jnp.where(cnt > 0, 1.0 / jnp.maximum(cnt, 1.0), 0.0)   # 1/c, 0 at c=0
    ratio = cnt / (cnt + 1.0)                                      # c/(c+1)

    def _shift_down(v):                                            # out[c] = v[c-1]
        return jnp.concatenate([jnp.zeros((1,), v.dtype), v[:-1]])

    def _shift_up(v):                                              # out[c] = v[c+1]
        return jnp.concatenate([v[1:], jnp.zeros((1,), v.dtype)])

    def fwd(q, p):                       # carry q[t] -> q[t+1]; record q[t]
        return p * _shift_down(q) + (1.0 - p) * q, q

    q0 = jnp.zeros((C,), jnp.float32).at[0].set(1.0)
    _, q_hist = lax.scan(fwd, q0, ps)                              # (T, C)

    def bwd(bar, inp):                   # carry bar[t+1] -> bar[t]; emit alpha_t
        p, q_t = inp
        alpha_t = p * jnp.sum(bar * inv_c * _shift_down(q_t))
        bar_new = p * ratio * _shift_up(bar) + (1.0 - p) * bar
        return bar_new, alpha_t

    bar_T = (cnt >= 1.0).astype(jnp.float32)
    _, alpha = lax.scan(bwd, bar_T, (ps, q_hist), reverse=True)
    return alpha                                                   # (T,)


# ---------------------------------------------------------------------------
# Pallas kernel: out[0, d] = sum_t alpha[t] * x[t, d]   (HBM-bandwidth bound)
# ---------------------------------------------------------------------------
def _wsum_kernel(a_ref, x_ref, o_ref, acc_ref):
    """One (t_chunk, tile_d) block of the weighted row-sum.

    a_ref  : (t_chunk, 1)       alpha column (lane-broadcast against x)
    x_ref  : (t_chunk, tile_d)  feature block (frames on sublanes, lane-dense)
    o_ref  : (1, tile_d)        output tile (resident across the T axis)
    acc_ref: (1, tile_d) f32    VMEM accumulator
    """
    t = pl.program_id(1)

    @pl.when(t == 0)
    def _():
        acc_ref[...] = jnp.zeros_like(acc_ref)

    # One VPU multiply + one XLU cross-sublane reduce per loaded element --
    # far below the HBM roofline, so x streams at memory speed.
    acc_ref[...] += jnp.sum(a_ref[...] * x_ref[...], axis=0, keepdims=True)

    @pl.when(t == pl.num_programs(1) - 1)
    def _():
        o_ref[...] = acc_ref[...]


# ---------------------------------------------------------------------------
# Tile / VMEM sizing (generation-aware, per review items 5-7)
# ---------------------------------------------------------------------------
def _vmem_capacity_bytes():
    try:
        cap = int(pltpu.get_tpu_info().vmem_capacity_bytes)
        if cap > 0:
            return cap
    except Exception:
        pass
    return 64 * 1024 * 1024              # conservative (v7x per-TensorCore size)


def _pick_tile_d(d_pad):
    """Lane-dense D tile; >= 2 tiles whenever possible (megacore / pipelining)."""
    if d_pad <= 128:
        return d_pad
    for cand in (512, 384, 256, 128):
        if cand <= d_pad // 2 and d_pad % cand == 0:
            return cand
    return 128


def _pick_t_chunk(T, tile_d, budget_bytes=8 * 1024 * 1024):
    """Time-chunk rows: multiple of 8, bounded by a modest VMEM budget and 512."""
    row_bytes = 2 * 4 * (tile_d + 1)     # double-buffered x row + alpha row
    max_rows = max(8, (budget_bytes // row_bytes) // 8 * 8)
    return int(min(_round_up(T, 8), 512, max_rows))


def maa_layer(p, x):
    """p: (1, T, 1) float32, x: (1, T, D) float32 -> (D,) float32."""
    ps = jnp.reshape(p, (-1,)).astype(jnp.float32)                       # (T,)
    xs = jnp.reshape(x, (x.shape[-2], x.shape[-1])).astype(jnp.float32)  # (T, D)
    T, D = xs.shape

    alpha = _maa_alpha(ps)                                               # (T,)

    d_pad = _round_up(D, 128)                       # lane-dense feature axis
    tile_d = _pick_tile_d(d_pad)
    t_chunk = _pick_t_chunk(T, tile_d)
    t_pad = _round_up(_round_up(T, 8), t_chunk)

    xs_p = jnp.pad(xs, ((0, t_pad - T), (0, d_pad - D)))
    a_col = jnp.pad(alpha, (0, t_pad - T)).reshape(t_pad, 1)  # zero-padded rows

    grid = (d_pad // tile_d, t_pad // t_chunk)      # D parallel, T reduction last

    est = (2 * 4 * t_chunk * (tile_d + 1)           # double-buffered x + alpha
           + 3 * 4 * tile_d)                        # out (double-buffered) + acc
    cap = _vmem_capacity_bytes()
    vmem_limit = int(min(max(32 * 1024 * 1024, 2 * est), (cap * 3) // 4))

    out = pl.pallas_call(
        _wsum_kernel,
        out_shape=jax.ShapeDtypeStruct((1, d_pad), jnp.float32),
        grid_spec=pltpu.PrefetchScalarGridSpec(
            num_scalar_prefetch=0,
            grid=grid,
            in_specs=[
                pl.BlockSpec((t_chunk, 1), lambda d, t: (t, 0)),       # alpha col
                pl.BlockSpec((t_chunk, tile_d), lambda d, t: (t, d)),  # x block
            ],
            out_specs=pl.BlockSpec((1, tile_d), lambda d, t: (0, d)),
            scratch_shapes=[pltpu.VMEM((1, tile_d), jnp.float32)],
        ),
        compiler_params=pltpu.CompilerParams(
            dimension_semantics=("parallel", "arbitrary"),
            vmem_limit_bytes=vmem_limit,
        ),
    )(a_col, xs_p)
    return out[0, :D]


# ---------------------------------------------------------------------------
# Pure-JAX transliteration of the PyTorch list-based forward (ground truth)
# ---------------------------------------------------------------------------
def maa_reference(p, x):
    ps = jnp.reshape(p, (-1,)).astype(jnp.float32)
    xs = jnp.reshape(x, (x.shape[-2], x.shape[-1])).astype(jnp.float32)
    T, D = xs.shape
    prev_qs = [jnp.zeros(()), jnp.ones(()), jnp.zeros(())]
    prev_ms = [jnp.zeros((D,)), jnp.zeros((D,))]
    for t in range(T):
        qs = [jnp.zeros(())]
        for i in range(1, len(prev_qs)):
            qs.append(ps[t] * prev_qs[i - 1] + (1 - ps[t]) * prev_qs[i])
        qs.append(jnp.zeros(()))
        ms = [jnp.zeros((D,))]
        for i in range(1, len(prev_ms)):
            ms.append((i - 1.0) / i * ps[t] * prev_ms[i - 1]
                      + (1 - ps[t]) * prev_ms[i]
                      + 1.0 / i * ps[t] * prev_qs[i] * xs[t])
        ms.append(jnp.zeros((D,)))
        prev_qs, prev_ms = qs, ms
    feats = jnp.stack(prev_ms[1:-1], axis=0)
    return jnp.sum(feats, axis=0)


if __name__ == "__main__":
    T, D = 8, 32
    key = jax.random.PRNGKey(0)
    kp, kx = jax.random.split(key)
    p = jax.random.uniform(kp, (1, T, 1), dtype=jnp.float32)   # probs in [0, 1)
    x = jax.random.normal(kx, (1, T, D), dtype=jnp.float32)

    out = jax.block_until_ready(maa_layer(p, x))
    ref = maa_reference(p, x)

    assert out.shape == (D,)
    assert jnp.allclose(out, ref, rtol=1e-4, atol=1e-4), "mismatch vs reference"

    print("KERNEL_OK")
</pallas_src>

<mosaic_0001>
module attributes {stable_mosaic.version = 11 : i64} {
  func.func @_wsum_kernel(%arg0: i32, %arg1: i32, %arg2: memref<8x1xf32, #tpu.memory_space<vmem>>, %arg3: memref<8x128xf32, #tpu.memory_space<vmem>>, %arg4: memref<1x128xf32, #tpu.memory_space<vmem>>, %arg5: memref<1x128xf32, #tpu.memory_space<vmem>>) attributes {dimension_semantics = [#tpu.dimension_semantics<parallel>, #tpu.dimension_semantics<arbitrary>], iteration_bounds = array<i64: 1, 1>, scalar_prefetch = 0 : i64, scratch_operands = 1 : i64, tpu.core_type = #tpu.core_type<tc>, window_params = [{transform_indices = @transform_0, window_bounds = array<i64: 8, 1>}, {transform_indices = @transform_1, window_bounds = array<i64: 8, 128>}, {transform_indices = @transform_2, window_bounds = array<i64: 1, 128>}]} {
    %c0_i32 = arith.constant 0 : i32
    %0 = arith.cmpi eq, %arg1, %c0_i32 : i32
    %1 = arith.extui %0 : i1 to i32
    %c0_i32_0 = arith.constant 0 : i32
    %2 = arith.cmpi ne, %1, %c0_i32_0 : i32
    scf.if %2 {
      %cst_10 = arith.constant 0.000000e+00 : f32
      %15 = vector.broadcast %cst_10 : f32 to vector<1x128xf32>
      %c0_11 = arith.constant 0 : index
      %c0_12 = arith.constant 0 : index
      %16 = vector.load %arg5[%c0_11, %c0_12] : memref<1x128xf32, #tpu.memory_space<vmem>>, vector<1x128xf32>
      tpu.vector_store %arg5[%c0_11, %c0_12], %15 {strides = array<i32>} : memref<1x128xf32, #tpu.memory_space<vmem>>, vector<1x128xf32>,
    } else {
    }
    %c0 = arith.constant 0 : index
    %c0_1 = arith.constant 0 : index
    %3 = vector.load %arg5[%c0, %c0_1] : memref<1x128xf32, #tpu.memory_space<vmem>>, vector<1x128xf32>
    %c0_2 = arith.constant 0 : index
    %c0_3 = arith.constant 0 : index
    %4 = vector.load %arg2[%c0_2, %c0_3] : memref<8x1xf32, #tpu.memory_space<vmem>>, vector<8x1xf32>
    %c0_4 = arith.constant 0 : index
    %c0_5 = arith.constant 0 : index
    %5 = vector.load %arg3[%c0_4, %c0_5] : memref<8x128xf32, #tpu.memory_space<vmem>>, vector<8x128xf32>
    %6 = vector.broadcast %4 : vector<8x1xf32> to vector<8x128xf32>
    %7 = arith.mulf %6, %5 : vector<8x128xf32>
    %cst = arith.constant dense<0.000000e+00> : vector<128xf32>
    %8 = vector.multi_reduction <add>, %7, %cst [0] : vector<8x128xf32> to vector<128xf32>
    %9 = vector.shape_cast %8 : vector<128xf32> to vector<1x128xf32>
    %10 = arith.addf %3, %9 : vector<1x128xf32>
    %c0_6 = arith.constant 0 : index
    %c0_7 = arith.constant 0 : index
    %11 = vector.load %arg5[%c0_6, %c0_7] : memref<1x128xf32, #tpu.memory_space<vmem>>, vector<1x128xf32>
    tpu.vector_store %arg5[%c0_6, %c0_7], %10 {strides = array<i32>} : memref<1x128xf32, #tpu.memory_space<vmem>>, vector<1x128xf32>,
    %c0_i32_8 = arith.constant 0 : i32
    %12 = arith.cmpi eq, %arg1, %c0_i32_8 : i32
    %13 = arith.extui %12 : i1 to i32
    %c0_i32_9 = arith.constant 0 : i32
    %14 = arith.cmpi ne, %13, %c0_i32_9 : i32
    scf.if %14 {
      %c0_10 = arith.constant 0 : index
      %c0_11 = arith.constant 0 : index
      %15 = vector.load %arg5[%c0_10, %c0_11] : memref<1x128xf32, #tpu.memory_space<vmem>>, vector<1x128xf32>
      %c0_12 = arith.constant 0 : index
      %c0_13 = arith.constant 0 : index
      %16 = vector.load %arg4[%c0_12, %c0_13] : memref<1x128xf32, #tpu.memory_space<vmem>>, vector<1x128xf32>
      tpu.vector_store %arg4[%c0_12, %c0_13], %15 {strides = array<i32>} : memref<1x128xf32, #tpu.memory_space<vmem>>, vector<1x128xf32>,
    } else {
    }
    return
  }
  func.func @transform_0(%arg0: i32, %arg1: i32) -> (i32, i32) {
    %c0_i32 = arith.constant 0 : i32
    %c0_i32_0 = arith.constant 0 : i32
    return %arg1, %c0_i32 : i32, i32
  }
  func.func @transform_1(%arg0: i32, %arg1: i32) -> (i32, i32) {
    %c0_i32 = arith.constant 0 : i32
    return %arg1, %arg0 : i32, i32
  }
  func.func @transform_2(%arg0: i32, %arg1: i32) -> (i32, i32) {
    %c0_i32 = arith.constant 0 : i32
    %c0_i32_0 = arith.constant 0 : i32
    return %c0_i32, %arg0 : i32, i32
  }
}

</mosaic_0001>

<bundles_post_ra>
// kernel: tpu_custom_call.1
= control target key start
LH: loop header
LB: loop body
LE: loop exit
PB: predicated region body
PF: predicated region fallthrough
CT: control target
= control target key end

     0   :  { %s117_s0 = inlined_call_operand.vmem [shape: f32[8,1], index: 0, kind: input, shape index: {}]   ;;  %s118_s1 = inlined_call_operand.vmem [shape: f32[8,128], index: 1, kind: input, shape index: {}]   ;;  %s119_s2 = inlined_call_operand.hbm [shape: f32[1,128], index: 2, kind: output, shape index: {}]  }
   0x1   :  { %v18_v0 = vld [vmem:[%s117_s0] sm:$0xff] }
   0x2   :  { %7 = vsyncpa [#allocation4], 0  ;;  %v81_v1 = vmov 0   ;;  %v82_v2 = vmov 0.0   ;;  %v19_v3 = vld [vmem:[%s118_s1] sm:$0xff]  ;;  %s83_s0 = smov [#allocation3]  }
   0x3   :  { %56 = vset.pattern.permute.xlu0 %v81_v1  ;;  %16 = vst [vmem:[#allocation2] sm:$0x1] %v82_v2  ;;  %s45_s13 = sshll.u32 %s83_s0, 4  ;;  %s46_s13 = int_to_ptr.vmem [resolvable:$true] %s45_s13 }
   0x4   :  { %22 = vperm.xlu0 %56, %v18_v0   ;;  %s57_s14 = scalar_lea.vmem %s46_s13, 16  ;;  %s61_s15 = scalar_lea.vmem %s46_s13, 32 }
   0x5   :  { %p58_p0 = scmp.ne.s32.totalorder %s46_s13, %s57_s14  ;;  %p62_p1 = scmp.lt.s32.totalorder %s46_s13, %s46_s13 }
   0x6   :  { %p63_p2 = scmp.lt.s32.totalorder %s61_s15, %s57_s14 }
   0x8   :  { %p64_p3 = por %p63_p2, %p62_p1 }
   0xa   :  { %v17_v11 = vld [vmem:[#allocation2] sm:$0x1]  ;;  %p65_p4 = pnand %p64_p3, %p58_p0 }
  0x83   :  { %v23_v4 = vpop.permute.xlu0 %22 }
  0x84   :  { %v25_v5 = vmul.f32 %v23_v4, %v19_v3 }
  0x86   :  { %v26_v6 = vrot.slane %v25_v5, 4 }
  0x88   :  { %v27_v7 = vadd.f32 %v26_v6, %v25_v5 }
  0x8a   :  { %v28_v8 = vrot.slane %v27_v7, 2 }
  0x8c   :  { %v29_v9 = vadd.f32 %v28_v8, %v27_v7 }
  0x8e   :  { %v30_v10 = vrot.slane %v29_v9, 1 }
  0x90   :  { %v31_v12 = vadd.f32 %v30_v10, %v29_v9 }
  0x92   :  { %v32_v13 = vadd.f32 %v31_v12, %v17_v11 }
  0x94   :  { %33 = vst [vmem:[#allocation2] sm:$0x1] %v32_v13 }
  0x9b   :  { %v37_v14 = vld [vmem:[#allocation2] sm:$0x1] }
  0x9c   :  { %38 = vst [vmem:[#allocation3] sm:$0x1] %v37_v14 }
  0x9d   :  { %68 = shalt.err (!%p65_p4)
}
  0x9e   :  { %s69_s17 = scalar_lea.hbm %s119_s2, 16 }
  0x9f   :  { %p70_p5 = scmp.ne.s32.totalorder %s119_s2, %s69_s17  ;;  %p73_p6 = scmp.lt.u32.totalorder %s69_s17, %s119_s2 }
  0xa1   :  { %p75_p7 = pnand %p73_p6, %p70_p5 }
  0xa3   :  { %78 = shalt.err (!%p75_p7)
}
  0xa4   :  { %48 = dma.vmem_to_hbm [thread:$0]  %s46_s13, 16, %s119_s2, [#allocation4]  }
  0xa5   :  { %79 = dma.done.wait [#allocation4], 16  }
  0xa6   :  { %80 = vsyncadd [#allocation4], 4294967280 }
  0xa7   :  { %52 = vsyncpa [#allocation4], 1 }

</bundles_post_ra>
